<compile_context>
chip_gen: v6e
topology: v6e:2x2x1
jax: 0.10.0
libtpu: 0.0.40
codegen_flags: <defaults>
</compile_context>

<pallas_src>
import jax
import jax.numpy as jnp
from jax.experimental import pallas as pl
from jax.experimental.pallas import tpu as pltpu


def _scale3d_kernel(g_ref, b_ref, x_ref, o_ref):
    # g_ref / b_ref: (tile_rows, 1) f32 per-row scale / shift columns.
    # x_ref / o_ref: (tile_rows, lane_w) tiles of the channel-fused slab.
    x = x_ref[...].astype(jnp.float32)
    o_ref[...] = (x * g_ref[...] + b_ref[...]).astype(o_ref.dtype)


def _pick_lane_width(dhw: int) -> int:
    """Largest multiple of 128 (<= 2048) that divides dhw.  dhw % 128 == 0."""
    for k in range(min(dhw // 128, 16), 0, -1):
        lw = 128 * k
        if dhw % lw == 0:
            return lw
    return 128


def _pick_tile_rows(total_rows: int, sub: int, max_rows: int) -> int:
    """Largest divisor of total_rows that is a multiple of `sub` and <= max_rows.

    Falls back to a non-dividing sublane multiple (partial trailing block) only
    when no such divisor exists.
    """
    if total_rows <= max_rows:
        return total_rows  # full extent -> always a legal block dim
    best = 0
    i = 1
    while i * i <= total_rows:
        if total_rows % i == 0:
            for d in (i, total_rows // i):
                if d <= max_rows and d % sub == 0 and d > best:
                    best = d
        i += 1
    if best:
        return best
    # Fallback: non-dividing tile; Pallas masks the partial trailing block.
    return min(total_rows, max(sub, (max_rows // sub) * sub))


def scale3d(
    x: jax.Array,
    gamma: jax.Array,
    beta: jax.Array,
    *,
    donate_x: bool = False,
    block_bytes_target: int = 4 * 1024 * 1024,
) -> jax.Array:
    """Per-channel scale & shift over NCDHW input (Scale3d.forward)."""
    N, C, D, H, W = x.shape
    assert gamma.shape == (C,) and beta.shape == (C,)

    dhw = D * H * W
    nc = N * C
    itemsize = x.dtype.itemsize
    sub = max(8, 32 // itemsize)  # sublane multiple: 8 (f32), 16 (bf16), 32 (i8)

    # ---- Layout: channel-fused, lane-dense, no padding copies. ----
    if dhw % 128 == 0:
        lane_w = _pick_lane_width(dhw)
        rows_per_slab = dhw // lane_w
    else:
        # Full-extent last dim: legal block shape, avoids jnp.pad + slice
        # (each of which would add a full extra HBM read+write).
        lane_w = dhw
        rows_per_slab = 1
    total_rows = nc * rows_per_slab
    x2 = x.reshape(total_rows, lane_w)  # pure layout plumbing (view-level reshape)

    # Per-row f32 scale/shift columns.  Channel is fastest within the nc axis
    # (x.reshape keeps C minor of N), so tile over N then repeat per slab row.
    g_rows = jnp.repeat(jnp.tile(gamma.astype(jnp.float32), N), rows_per_slab)
    b_rows = jnp.repeat(jnp.tile(beta.astype(jnp.float32), N), rows_per_slab)
    g_rows = g_rows.reshape(total_rows, 1)
    b_rows = b_rows.reshape(total_rows, 1)

    # ---- Tile rows: ~4 MiB blocks, chosen to divide total_rows exactly. ----
    max_rows = max(1, block_bytes_target // (lane_w * itemsize))
    tile_rows = _pick_tile_rows(total_rows, sub, max_rows)
    grid = (pl.cdiv(total_rows, tile_rows),)

    slab_spec = pl.BlockSpec((tile_rows, lane_w), lambda i: (i, 0))
    par_spec = pl.BlockSpec((tile_rows, 1), lambda i: (i, 0))

    block_bytes = tile_rows * lane_w * itemsize
    # in + out double-buffered (+ tiny gamma/beta columns) with headroom;
    # stays within v7x's 64 MiB physical VMEM.
    vmem_limit = int(min(48 << 20, max(32 << 20, 5 * block_bytes)))

    out = pl.pallas_call(
        _scale3d_kernel,
        grid=grid,
        in_specs=[par_spec, par_spec, slab_spec],
        out_specs=slab_spec,
        out_shape=jax.ShapeDtypeStruct((total_rows, lane_w), x.dtype),
        compiler_params=pltpu.CompilerParams(
            dimension_semantics=("parallel",),
            vmem_limit_bytes=vmem_limit,
        ),
        cost_estimate=pl.CostEstimate(
            flops=2 * x.size,
            transcendentals=0,
            bytes_accessed=2 * x.size * itemsize + 2 * total_rows * 4,
        ),
        input_output_aliases=({2: 0} if donate_x else {}),
    )(g_rows, b_rows, x2)

    return out.reshape(N, C, D, H, W)


def _reference(x, gamma, beta):
    g = gamma.astype(jnp.float32)[None, :, None, None, None]
    b = beta.astype(jnp.float32)[None, :, None, None, None]
    return (x.astype(jnp.float32) * g + b).astype(x.dtype)


if __name__ == "__main__":
    key = jax.random.PRNGKey(0)
    kx, kg, kb, kx2, kx3 = jax.random.split(key, 5)

    ok = True

    # Case 1: f32, D*H*W a multiple of 128 (lane-dense single-block path).
    N, C, D, H, W = 2, 4, 4, 8, 16
    x = jax.random.normal(kx, (N, C, D, H, W), dtype=jnp.float32)
    gamma = 1.0 + 0.1 * jax.random.normal(kg, (C,), dtype=jnp.float32)
    beta = 0.1 * jax.random.normal(kb, (C,), dtype=jnp.float32)
    y = jax.block_until_ready(scale3d(x, gamma, beta))
    ok &= bool(y.shape == x.shape and y.dtype == x.dtype)
    ok &= bool(jnp.allclose(y, _reference(x, gamma, beta), atol=1e-6, rtol=1e-6))

    # Case 2: odd spatial dims (D*H*W = 105) -> full-extent last-dim path
    # (no padding copy, no trailing slice).
    N2, C2, D2, H2, W2 = 1, 3, 3, 5, 7
    x_odd = jax.random.normal(kx2, (N2, C2, D2, H2, W2), dtype=jnp.float32)
    g2, b2 = gamma[:C2], beta[:C2]
    y_odd = jax.block_until_ready(scale3d(x_odd, g2, b2))
    ok &= bool(jnp.allclose(y_odd, _reference(x_odd, g2, b2), atol=1e-6, rtol=1e-6))

    # Case 3: bf16 activations with f32 parameters (f32 compute, bf16 store).
    x_bf = x.astype(jnp.bfloat16)
    y_bf = jax.block_until_ready(scale3d(x_bf, gamma, beta))
    ok &= bool(y_bf.dtype == jnp.bfloat16)
    ok &= bool(
        jnp.allclose(
            y_bf.astype(jnp.float32),
            _reference(x_bf, gamma, beta).astype(jnp.float32),
            atol=3e-2,
            rtol=3e-2,
        )
    )

    # Case 4: many channels / small spatial -> channel-fused multi-step grid.
    # A small block_bytes_target exercises the tiled (multi-grid-step) path at
    # test-friendly sizes; production keeps the 4 MiB default.
    N4, C4, D4, H4, W4 = 2, 8, 4, 16, 32
    x4 = jax.random.normal(kx3, (N4, C4, D4, H4, W4), dtype=jnp.float32)
    g4 = 1.0 + 0.1 * jax.random.normal(kg, (C4,), dtype=jnp.float32)
    b4 = 0.1 * jax.random.normal(kb, (C4,), dtype=jnp.float32)
    y4 = jax.block_until_ready(scale3d(x4, g4, b4, block_bytes_target=64 * 1024))
    ok &= bool(jnp.allclose(y4, _reference(x4, g4, b4), atol=1e-6, rtol=1e-6))

    assert ok, "mismatch vs reference"
    print("KERNEL_OK")
</pallas_src>

<mosaic_0001>
module attributes {stable_mosaic.version = 11 : i64} {
  func.func @_scale3d_kernel(%arg0: i32, %arg1: memref<8x1xf32, #tpu.memory_space<vmem>>, %arg2: memref<8x1xf32, #tpu.memory_space<vmem>>, %arg3: memref<8x512xf32, #tpu.memory_space<vmem>>, %arg4: memref<8x512xf32, #tpu.memory_space<vmem>>) attributes {dimension_semantics = [#tpu.dimension_semantics<parallel>], iteration_bounds = array<i64: 1>, scalar_prefetch = 0 : i64, scratch_operands = 0 : i64, tpu.core_type = #tpu.core_type<tc>, window_params = [{transform_indices = @transform_0, window_bounds = array<i64: 8, 1>}, {transform_indices = @transform_1, window_bounds = array<i64: 8, 1>}, {transform_indices = @transform_2, window_bounds = array<i64: 8, 512>}, {transform_indices = @transform_3, window_bounds = array<i64: 8, 512>}]} {
    %c0 = arith.constant 0 : index
    %c0_0 = arith.constant 0 : index
    %0 = vector.load %arg3[%c0, %c0_0] : memref<8x512xf32, #tpu.memory_space<vmem>>, vector<8x512xf32>
    %c0_1 = arith.constant 0 : index
    %c0_2 = arith.constant 0 : index
    %1 = vector.load %arg1[%c0_1, %c0_2] : memref<8x1xf32, #tpu.memory_space<vmem>>, vector<8x1xf32>
    %2 = vector.broadcast %1 : vector<8x1xf32> to vector<8x512xf32>
    %3 = arith.mulf %0, %2 : vector<8x512xf32>
    %c0_3 = arith.constant 0 : index
    %c0_4 = arith.constant 0 : index
    %4 = vector.load %arg2[%c0_3, %c0_4] : memref<8x1xf32, #tpu.memory_space<vmem>>, vector<8x1xf32>
    %5 = vector.broadcast %4 : vector<8x1xf32> to vector<8x512xf32>
    %6 = arith.addf %3, %5 : vector<8x512xf32>
    %c0_5 = arith.constant 0 : index
    %c0_6 = arith.constant 0 : index
    %7 = vector.load %arg4[%c0_5, %c0_6] : memref<8x512xf32, #tpu.memory_space<vmem>>, vector<8x512xf32>
    tpu.vector_store %arg4[%c0_5, %c0_6], %6 {strides = array<i32>} : memref<8x512xf32, #tpu.memory_space<vmem>>, vector<8x512xf32>,
    return
  }
  func.func @transform_0(%arg0: i32) -> (i32, i32) {
    %c0_i32 = arith.constant 0 : i32
    %c0_i32_0 = arith.constant 0 : i32
    return %arg0, %c0_i32 : i32, i32
  }
  func.func @transform_1(%arg0: i32) -> (i32, i32) {
    %c0_i32 = arith.constant 0 : i32
    %c0_i32_0 = arith.constant 0 : i32
    return %arg0, %c0_i32 : i32, i32
  }
  func.func @transform_2(%arg0: i32) -> (i32, i32) {
    %c0_i32 = arith.constant 0 : i32
    %c0_i32_0 = arith.constant 0 : i32
    return %arg0, %c0_i32 : i32, i32
  }
  func.func @transform_3(%arg0: i32) -> (i32, i32) {
    %c0_i32 = arith.constant 0 : i32
    %c0_i32_0 = arith.constant 0 : i32
    return %arg0, %c0_i32 : i32, i32
  }
}

</mosaic_0001>

<bundles_post_ra>
// kernel: tpu_custom_call.1
= control target key start
LH: loop header
LB: loop body
LE: loop exit
PB: predicated region body
PF: predicated region fallthrough
CT: control target
= control target key end

     0   :  { %8 = vsyncpa [#allocation3], 0  ;;  %s153_s0 = inlined_call_operand.vmem [shape: f32[8,1], index: 0, kind: input, shape index: {}]   ;;  %s154_s1 = inlined_call_operand.vmem [shape: f32[8,1], index: 1, kind: input, shape index: {}]   ;;  %s155_s2 = inlined_call_operand.hbm [shape: f32[8,512], index: 2, kind: input, shape index: {}]   ;;  %s156_s3 = inlined_call_operand.hbm [shape: f32[8,512], index: 3, kind: output, shape index: {}]  }
   0x1   :  { %9 = vsyncpa [#allocation4], 0  ;;  %s118_s12 = smov [#allocation2]  }
   0x2   :  { %s20_s13 = sshll.u32 %s118_s12, 4  ;;  %s21_s13 = int_to_ptr.vmem [resolvable:$true] %s20_s13 }
   0x3   :  { %s82_s14 = scalar_lea.vmem %s21_s13, 512  ;;  %p87_p1 = scmp.lt.s32.totalorder %s21_s13, %s21_s13 }
   0x4   :  { %p83_p0 = scmp.ne.s32.totalorder %s21_s13, %s82_s14  ;;  %p88_p2 = scmp.lt.s32.totalorder %s82_s14, %s82_s14 }
   0x6   :  { %p89_p3 = por %p88_p2, %p87_p1 }
   0x8   :  { %p90_p4 = pnand %p89_p3, %p83_p0 }
   0xa   :  { %93 = shalt.err (!%p90_p4)
}
   0xb   :  { %23 = dma.hbm_to_vmem [thread:$0]  %s155_s2, 512, %s21_s13, [#allocation3]  }
   0xc   :  { %114 = dma.done.wait [#allocation3], 512  }
   0xd   :  { %115 = vsyncadd [#allocation3], 4294966784  ;;  %v119_v0 = vmov 0   ;;  %v31_v1 = vld [vmem:[%s153_s0] sm:$0xff]  ;;  %v28_v5 = vld [vmem:[#allocation2 + $0x8] sm:$0xff]  ;;  %s120_s2 = smov [#allocation5]  }
   0xe   :  { %73 = vset.pattern.permute.xlu0 %v119_v0  ;;  %v41_v2 = vld [vmem:[%s154_s1] sm:$0xff]  ;;  %v29_v6 = vld [vmem:[#allocation2 + $0x10] sm:$0xff]  ;;  %v30_v7 = vld [vmem:[#allocation2 + $0x18] sm:$0xff]  ;;  %s61_s21 = sshll.u32 %s120_s2, 4  ;;  %s62_s21 = int_to_ptr.vmem [resolvable:$true] %s61_s21 }
   0xf   :  { %34 = vperm.xlu0 %73, %v31_v1   ;;  %v27_v3 = vld [vmem:[#allocation2] sm:$0xff]  ;;  %s94_s0 = scalar_lea.vmem %s62_s21, 512  ;;  %p99_p6 = scmp.lt.s32.totalorder %s62_s21, %s62_s21 }
  0x10   :  { %p95_p5 = scmp.ne.s32.totalorder %s62_s21, %s94_s0  ;;  %p100_p7 = scmp.lt.s32.totalorder %s94_s0, %s94_s0 }
  0x12   :  { %p101_p8 = por %p100_p7, %p99_p6 }
  0x13   :  { %44 = vperm.xlu0 %73, %v41_v2  }
  0x14   :  { %p102_p9 = pnand %p101_p8, %p95_p5 }
  0x8a   :  { %v35_v4 = vpop.permute.xlu0 %34 }
  0x8b   :  { %v37_v8 = vmul.f32 %v35_v4, %v27_v3  ;;  %v38_v9 = vmul.f32 %v35_v4, %v28_v5  ;;  %v39_v10 = vmul.f32 %v35_v4, %v29_v6  ;;  %v40_v11 = vmul.f32 %v35_v4, %v30_v7 }
  0x8e   :  { %v45_v12 = vpop.permute.xlu0 %44 }
  0x8f   :  { %v47_v13 = vadd.f32 %v45_v12, %v37_v8  ;;  %v48_v14 = vadd.f32 %v45_v12, %v38_v9  ;;  %v49_v15 = vadd.f32 %v45_v12, %v39_v10  ;;  %v50_v16 = vadd.f32 %v45_v12, %v40_v11 }
  0x91   :  { %51 = vst [vmem:[#allocation5] sm:$0xff] %v47_v13  ;;  %52 = vst [vmem:[#allocation5 + $0x8] sm:$0xff] %v48_v14 }
  0x92   :  { %53 = vst [vmem:[#allocation5 + $0x10] sm:$0xff] %v49_v15  ;;  %54 = vst [vmem:[#allocation5 + $0x18] sm:$0xff] %v50_v16 }
  0x93   :  { %105 = shalt.err (!%p102_p9)
}
  0x94   :  { %64 = dma.vmem_to_hbm [thread:$0]  %s62_s21, 512, %s156_s3, [#allocation4]  }
  0x95   :  { %116 = dma.done.wait [#allocation4], 512  }
  0x96   :  { %117 = vsyncadd [#allocation4], 4294966784 }
  0x97   :  { %68 = vsyncpa [#allocation3], 1 }
  0x98   :  { %69 = vsyncpa [#allocation4], 1 }

</bundles_post_ra>
